<compile_context>
chip_gen: v6e
topology: v6e:2x2x1
jax: 0.10.0
libtpu: 0.0.40
codegen_flags: <defaults>
</compile_context>

<pallas_src>
import functools

import jax
import jax.numpy as jnp
from jax.experimental import pallas as pl
from jax.experimental.pallas import tpu as pltpu

K_IN = 120
K_PAD = 128    # 120 -> 128 (lane aligned)
H1 = 256
H2 = 512
N_OUT = 2
N_PAD = 128    # 2 -> 128 (lane-dense output block)
SUB = 16       # bf16 sublane packing


def _mlp_kernel(x_ref, w1_ref, b1_ref, w2_ref, b2_ref, w3_ref, b3_ref, o_ref):
    x = x_ref[...]                                           # (TB, 128) bf16

    # layer 1: Linear(120->256) + ReLU   (bf16 MXU inputs, f32 accumulate)
    h1 = jnp.dot(x, w1_ref[...], preferred_element_type=jnp.float32)
    h1 = jnp.maximum(h1 + b1_ref[...], 0.0)                  # (TB, 256) f32

    # layer 2: Linear(256->512) + ReLU
    h2 = jnp.dot(h1.astype(jnp.bfloat16), w2_ref[...],
                 preferred_element_type=jnp.float32)
    h2 = jnp.maximum(h2 + b2_ref[...], 0.0)                  # (TB, 512) f32

    # layer 3: Linear(512->2), padded to 128 output lanes (lane-dense store)
    h3 = jnp.dot(h2.astype(jnp.bfloat16), w3_ref[...],
                 preferred_element_type=jnp.float32)
    o_ref[...] = (h3 + b3_ref[...]).astype(o_ref.dtype)      # (TB, 128) bf16


def _round_up(n, m):
    return ((n + m - 1) // m) * m


def _cdiv(a, b):
    return -(-a // b)


def prepare_params(params):
    """One-time layout plumbing: pad + cast weights to bf16 (not per-call)."""
    w1 = jnp.pad(params["w1"], ((0, K_PAD - K_IN), (0, 0))).astype(jnp.bfloat16)
    w2 = params["w2"].astype(jnp.bfloat16)
    w3 = jnp.pad(params["w3"], ((0, 0), (0, N_PAD - N_OUT))).astype(jnp.bfloat16)
    b1 = params["b1"].astype(jnp.float32)
    b2 = params["b2"].astype(jnp.float32)
    b3 = jnp.pad(params["b3"], ((0, 0), (0, N_PAD - N_OUT))).astype(jnp.float32)
    return {"w1": w1, "b1": b1, "w2": w2, "b2": b2, "w3": w3, "b3": b3}


def home_s_forward(x, prepared, *, tb_max=2048):
    """x: (B, 120) float32. prepared: output of prepare_params (bf16 weights)."""
    B = x.shape[0]

    # ---- batch tiling: TB multiple of 16; >=2 even tiles when B > 16 -----
    if B <= SUB:
        TB = SUB
    else:
        nt = max(2, _cdiv(B, tb_max))        # at least 2 tiles (v7x: 2 TCs)
        nt += nt % 2                         # even tile count
        TB = min(tb_max, _round_up(_cdiv(B, nt), SUB))
    B_pad = _round_up(B, TB)
    num_tiles = B_pad // TB

    # Single fused pad + cast of x (fusable into the pallas_call input).
    xp = jnp.pad(x, ((0, B_pad - B), (0, K_PAD - K_IN))).astype(jnp.bfloat16)

    resident = lambda shape: pl.BlockSpec(shape, lambda i: (0, 0))

    flops = 2 * B_pad * (K_PAD * H1 + H1 * H2 + H2 * N_PAD)
    bytes_accessed = (
        (K_PAD * H1 + H1 * H2 + H2 * N_PAD) * 2      # bf16 weights
        + (H1 + H2 + N_PAD) * 4                      # f32 biases
        + B_pad * K_PAD * 2                          # bf16 x
        + B_pad * N_PAD * 2                          # bf16 out
    )

    out = pl.pallas_call(
        _mlp_kernel,
        out_shape=jax.ShapeDtypeStruct((B_pad, N_PAD), jnp.bfloat16),
        grid=(num_tiles,),
        in_specs=[
            pl.BlockSpec((TB, K_PAD), lambda i: (i, 0)),     # x tile (streamed)
            resident((K_PAD, H1)), resident((1, H1)),        # w1, b1 (VMEM-resident)
            resident((H1, H2)),    resident((1, H2)),        # w2, b2
            resident((H2, N_PAD)), resident((1, N_PAD)),     # w3, b3
        ],
        out_specs=pl.BlockSpec((TB, N_PAD), lambda i: (i, 0)),
        compiler_params=pltpu.CompilerParams(
            dimension_semantics=("parallel",),
            vmem_limit_bytes=32 * 1024 * 1024,
            allow_input_fusion=[True] + [False] * 6,
        ),
        cost_estimate=pl.CostEstimate(
            flops=flops, transcendentals=0, bytes_accessed=bytes_accessed),
    )(xp, prepared["w1"], prepared["b1"], prepared["w2"], prepared["b2"],
      prepared["w3"], prepared["b3"])

    return out[:B, :N_OUT].astype(jnp.float32)


def init_params(key):
    """Deterministic init mirroring nn.Linear default (uniform +-1/sqrt(fan_in)).

    Weights stored transposed relative to PyTorch: [in_features, out_features].
    """
    def linear(key, fan_in, fan_out):
        kw, kb = jax.random.split(key)
        bound = 1.0 / jnp.sqrt(fan_in)
        w = jax.random.uniform(kw, (fan_in, fan_out), jnp.float32, -bound, bound)
        b = jax.random.uniform(kb, (1, fan_out), jnp.float32, -bound, bound)
        return w, b

    k1, k2, k3 = jax.random.split(key, 3)
    w1, b1 = linear(k1, 120, 256)
    w2, b2 = linear(k2, 256, 512)
    w3, b3 = linear(k3, 512, 2)
    return {"w1": w1, "b1": b1, "w2": w2, "b2": b2, "w3": w3, "b3": b3}


def _reference(x, p):
    """Pure-JAX reference mimicking the kernel's bf16-input / f32-accum math
    (f32 output; the kernel adds one extra bf16 rounding on the output)."""
    f32 = jnp.float32
    h1 = jnp.dot(x.astype(jnp.bfloat16), p["w1"].astype(jnp.bfloat16),
                 preferred_element_type=f32) + p["b1"]
    h1 = jnp.maximum(h1, 0.0)
    h2 = jnp.dot(h1.astype(jnp.bfloat16), p["w2"].astype(jnp.bfloat16),
                 preferred_element_type=f32) + p["b2"]
    h2 = jnp.maximum(h2, 0.0)
    return jnp.dot(h2.astype(jnp.bfloat16), p["w3"].astype(jnp.bfloat16),
                   preferred_element_type=f32) + p["b3"]


if __name__ == "__main__":
    key = jax.random.PRNGKey(0)
    kx, kp = jax.random.split(key)

    params = init_params(kp)
    prepared = prepare_params(params)

    fwd = jax.jit(functools.partial(home_s_forward, tb_max=2048))

    # Small single-tile case and a small multi-tile case (exercises padding
    # of batch rows and the 2-tile grid path used on v7x).
    for B in (8, 20):
        x = jax.random.normal(jax.random.fold_in(kx, B), (B, 120), jnp.float32)
        out = jax.block_until_ready(fwd(x, prepared))
        ref = _reference(x, params)
        assert out.shape == (B, 2), out.shape
        # bf16 inputs + bf16 output rounding vs f32 reference -> loose-ish tol.
        assert jnp.allclose(out, ref, atol=1e-2, rtol=1e-2), \
            float(jnp.max(jnp.abs(out - ref)))

    print("KERNEL_OK")
</pallas_src>

<mosaic_0001>
module attributes {stable_mosaic.version = 11 : i64} {
  func.func @_mlp_kernel(%arg0: i32, %arg1: memref<16x128xbf16, #tpu.memory_space<vmem>>, %arg2: memref<128x256xbf16, #tpu.memory_space<vmem>>, %arg3: memref<1x256xf32, #tpu.memory_space<vmem>>, %arg4: memref<256x512xbf16, #tpu.memory_space<vmem>>, %arg5: memref<1x512xf32, #tpu.memory_space<vmem>>, %arg6: memref<512x128xbf16, #tpu.memory_space<vmem>>, %arg7: memref<1x128xf32, #tpu.memory_space<vmem>>, %arg8: memref<16x128xbf16, #tpu.memory_space<vmem>>) attributes {dimension_semantics = [#tpu.dimension_semantics<parallel>], iteration_bounds = array<i64: 1>, scalar_prefetch = 0 : i64, scratch_operands = 0 : i64, tpu.core_type = #tpu.core_type<tc>, window_params = [{transform_indices = @transform_0, window_bounds = array<i64: 16, 128>}, {pipeline_mode = #tpu.pipeline_mode<synchronous>, transform_indices = @transform_1, window_bounds = array<i64: 128, 256>}, {pipeline_mode = #tpu.pipeline_mode<synchronous>, transform_indices = @transform_2, window_bounds = array<i64: 1, 256>}, {pipeline_mode = #tpu.pipeline_mode<synchronous>, transform_indices = @transform_3, window_bounds = array<i64: 256, 512>}, {pipeline_mode = #tpu.pipeline_mode<synchronous>, transform_indices = @transform_4, window_bounds = array<i64: 1, 512>}, {pipeline_mode = #tpu.pipeline_mode<synchronous>, transform_indices = @transform_5, window_bounds = array<i64: 512, 128>}, {pipeline_mode = #tpu.pipeline_mode<synchronous>, transform_indices = @transform_6, window_bounds = array<i64: 1, 128>}, {transform_indices = @transform_7, window_bounds = array<i64: 16, 128>}]} {
    %c0 = arith.constant 0 : index
    %c0_0 = arith.constant 0 : index
    %0 = vector.load %arg1[%c0, %c0_0] : memref<16x128xbf16, #tpu.memory_space<vmem>>, vector<16x128xbf16>
    %c0_1 = arith.constant 0 : index
    %c0_2 = arith.constant 0 : index
    %1 = vector.load %arg2[%c0_1, %c0_2] : memref<128x256xbf16, #tpu.memory_space<vmem>>, vector<128x256xbf16>
    %cst = arith.constant dense<0.000000e+00> : vector<16x256xf32>
    %2 = tpu.matmul %0, %1, %cst {dimension_numbers = #tpu.dot_dimension_numbers<[1], [0], [0], [1], [0, 0, 1, 1], [], []>} : vector<16x128xbf16>, vector<128x256xbf16>, vector<16x256xf32> -> vector<16x256xf32>
    %c0_3 = arith.constant 0 : index
    %c0_4 = arith.constant 0 : index
    %3 = vector.load %arg3[%c0_3, %c0_4] : memref<1x256xf32, #tpu.memory_space<vmem>>, vector<1x256xf32>
    %4 = vector.broadcast %3 : vector<1x256xf32> to vector<16x256xf32>
    %5 = arith.addf %2, %4 : vector<16x256xf32>
    %cst_5 = arith.constant 0.000000e+00 : f32
    %6 = vector.broadcast %cst_5 : f32 to vector<16x256xf32>
    %7 = arith.maximumf %5, %6 : vector<16x256xf32>
    %8 = arith.truncf %7 : vector<16x256xf32> to vector<16x256xbf16>
    %c0_6 = arith.constant 0 : index
    %c0_7 = arith.constant 0 : index
    %9 = vector.load %arg4[%c0_6, %c0_7] : memref<256x512xbf16, #tpu.memory_space<vmem>>, vector<256x512xbf16>
    %cst_8 = arith.constant dense<0.000000e+00> : vector<16x512xf32>
    %10 = tpu.matmul %8, %9, %cst_8 {dimension_numbers = #tpu.dot_dimension_numbers<[1], [0], [0], [1], [0, 0, 1, 1], [], []>} : vector<16x256xbf16>, vector<256x512xbf16>, vector<16x512xf32> -> vector<16x512xf32>
    %c0_9 = arith.constant 0 : index
    %c0_10 = arith.constant 0 : index
    %11 = vector.load %arg5[%c0_9, %c0_10] : memref<1x512xf32, #tpu.memory_space<vmem>>, vector<1x512xf32>
    %12 = vector.broadcast %11 : vector<1x512xf32> to vector<16x512xf32>
    %13 = arith.addf %10, %12 : vector<16x512xf32>
    %cst_11 = arith.constant 0.000000e+00 : f32
    %14 = vector.broadcast %cst_11 : f32 to vector<16x512xf32>
    %15 = arith.maximumf %13, %14 : vector<16x512xf32>
    %16 = arith.truncf %15 : vector<16x512xf32> to vector<16x512xbf16>
    %c0_12 = arith.constant 0 : index
    %c0_13 = arith.constant 0 : index
    %17 = vector.load %arg6[%c0_12, %c0_13] : memref<512x128xbf16, #tpu.memory_space<vmem>>, vector<512x128xbf16>
    %cst_14 = arith.constant dense<0.000000e+00> : vector<16x128xf32>
    %18 = tpu.matmul %16, %17, %cst_14 {dimension_numbers = #tpu.dot_dimension_numbers<[1], [0], [0], [1], [0, 0, 1, 1], [], []>} : vector<16x512xbf16>, vector<512x128xbf16>, vector<16x128xf32> -> vector<16x128xf32>
    %c0_15 = arith.constant 0 : index
    %c0_16 = arith.constant 0 : index
    %19 = vector.load %arg7[%c0_15, %c0_16] : memref<1x128xf32, #tpu.memory_space<vmem>>, vector<1x128xf32>
    %20 = vector.broadcast %19 : vector<1x128xf32> to vector<16x128xf32>
    %21 = arith.addf %18, %20 : vector<16x128xf32>
    %22 = arith.truncf %21 : vector<16x128xf32> to vector<16x128xbf16>
    %c0_17 = arith.constant 0 : index
    %c0_18 = arith.constant 0 : index
    %23 = vector.load %arg8[%c0_17, %c0_18] : memref<16x128xbf16, #tpu.memory_space<vmem>>, vector<16x128xbf16>
    tpu.vector_store %arg8[%c0_17, %c0_18], %22 {strides = array<i32>} : memref<16x128xbf16, #tpu.memory_space<vmem>>, vector<16x128xbf16>,
    return
  }
  func.func @transform_0(%arg0: i32) -> (i32, i32) {
    %c0_i32 = arith.constant 0 : i32
    %c0_i32_0 = arith.constant 0 : i32
    return %arg0, %c0_i32 : i32, i32
  }
  func.func @transform_1(%arg0: i32) -> (i32, i32) {
    %c0_i32 = arith.constant 0 : i32
    %c0_i32_0 = arith.constant 0 : i32
    %c0_i32_1 = arith.constant 0 : i32
    return %c0_i32, %c0_i32_0 : i32, i32
  }
  func.func @transform_2(%arg0: i32) -> (i32, i32) {
    %c0_i32 = arith.constant 0 : i32
    %c0_i32_0 = arith.constant 0 : i32
    %c0_i32_1 = arith.constant 0 : i32
    return %c0_i32, %c0_i32_0 : i32, i32
  }
  func.func @transform_3(%arg0: i32) -> (i32, i32) {
    %c0_i32 = arith.constant 0 : i32
    %c0_i32_0 = arith.constant 0 : i32
    %c0_i32_1 = arith.constant 0 : i32
    return %c0_i32, %c0_i32_0 : i32, i32
  }
  func.func @transform_4(%arg0: i32) -> (i32, i32) {
    %c0_i32 = arith.constant 0 : i32
    %c0_i32_0 = arith.constant 0 : i32
    %c0_i32_1 = arith.constant 0 : i32
    return %c0_i32, %c0_i32_0 : i32, i32
  }
  func.func @transform_5(%arg0: i32) -> (i32, i32) {
    %c0_i32 = arith.constant 0 : i32
    %c0_i32_0 = arith.constant 0 : i32
    %c0_i32_1 = arith.constant 0 : i32
    return %c0_i32, %c0_i32_0 : i32, i32
  }
  func.func @transform_6(%arg0: i32) -> (i32, i32) {
    %c0_i32 = arith.constant 0 : i32
    %c0_i32_0 = arith.constant 0 : i32
    %c0_i32_1 = arith.constant 0 : i32
    return %c0_i32, %c0_i32_0 : i32, i32
  }
  func.func @transform_7(%arg0: i32) -> (i32, i32) {
    %c0_i32 = arith.constant 0 : i32
    %c0_i32_0 = arith.constant 0 : i32
    return %arg0, %c0_i32 : i32, i32
  }
}

</mosaic_0001>

<bundles_post_ra>
// kernel: home_s_forward.2
= control target key start
LH: loop header
LB: loop body
LE: loop exit
PB: predicated region body
PF: predicated region fallthrough
CT: control target
= control target key end

     0   :  { %s1631_s0 = inlined_call_operand.hbm [shape: bf16[128,256], index: 0, kind: input, shape index: {}]   ;;  %s1632_s1 = inlined_call_operand.vmem [shape: f32[1,256], index: 1, kind: input, shape index: {}]   ;;  %s1633_s2 = inlined_call_operand.hbm [shape: bf16[256,512], index: 2, kind: input, shape index: {}]   ;;  %s1634_s3 = inlined_call_operand.vmem [shape: f32[1,512], index: 3, kind: input, shape index: {}]   ;;  %s1635_s4 = inlined_call_operand.hbm [shape: bf16[512,128], index: 4, kind: input, shape index: {}]   ;;  %s1636_s5 = inlined_call_operand.vmem [shape: f32[1,128], index: 5, kind: input, shape index: {}]   ;;  %s1637_s6 = inlined_call_operand.vmem [shape: bf16[8,120], index: 6, kind: input, shape index: {}]   ;;  %s1638_s7 = inlined_call_operand.<no memory space> [shape: bf16[], index: 7, kind: input, shape index: {}]   ;;  %s1639_s8 = inlined_call_operand.vmem [shape: bf16[16,128], index: 8, kind: output, shape index: {}]  }
   0x1   :  { %v13_v0 = vstv %s1638_s7 }
   0x2   :  { %v1587_v1 = vunpack.i.l.bf16 %v13_v0 }
   0x3   :  { %18 = vsyncpa [#allocation8], 0 }
   0x4   :  { %19 = vsyncpa [#allocation10], 0  ;;  %s1529_s29 = smov [#allocation9]  }
   0x5   :  { %s41_s30 = sshll.u32 %s1529_s29, 4  ;;  %s42_s30 = int_to_ptr.vmem [resolvable:$true] %s41_s30 }
   0x6   :  { %s1473_s9 = scalar_lea.vmem %s42_s30, 8192  ;;  %p1478_p1 = scmp.lt.s32.totalorder %s42_s30, %s42_s30 }
   0x7   :  { %p1474_p0 = scmp.ne.s32.totalorder %s42_s30, %s1473_s9  ;;  %p1479_p2 = scmp.lt.s32.totalorder %s1473_s9, %s1473_s9 }
   0x9   :  { %p1480_p3 = por %p1479_p2, %p1478_p1 }
   0xb   :  { %p1481_p4 = pnand %p1480_p3, %p1474_p0 }
   0xd   :  { %1484 = shalt.err (!%p1481_p4)
}
   0xe   :  { %s1530_s10 = smov 256   ;;  %s1531_s11 = smov 16  }
   0xf   :  { %47 = dma.hbm_to_vmem [thread:$0]  %s1633_s2, 8192, %s42_s30, [#allocation10], %s1530_s10, %s1530_s10, %s1531_s11  }
  0x10   :  { %s1532_s7 = smov [#allocation7]  }
  0x11   :  { %s27_s14 = sshll.u32 %s1532_s7, 4  ;;  %s28_s14 = int_to_ptr.vmem [resolvable:$true] %s27_s14 }
  0x12   :  { %s1493_s15 = scalar_lea.vmem %s28_s14, 2048  ;;  %p1498_p6 = scmp.lt.s32.totalorder %s28_s14, %s28_s14 }
  0x13   :  { %p1494_p5 = scmp.ne.s32.totalorder %s28_s14, %s1493_s15  ;;  %p1499_p7 = scmp.lt.s32.totalorder %s1493_s15, %s1493_s15 }
  0x15   :  { %p1500_p8 = por %p1499_p7, %p1498_p6 }
  0x17   :  { %p1501_p9 = pnand %p1500_p8, %p1494_p5 }
  0x19   :  { %1504 = shalt.err (!%p1501_p9)
}
  0x1a   :  { %s1533_s16 = smov 128   ;;  %s1534_s17 = smov 8  }
  0x1b   :  { %33 = dma.hbm_to_vmem [thread:$0]  %s1631_s0, 2048, %s28_s14, [#allocation8], %s1533_s16, %s1533_s16, %s1534_s17  }
  0x1c   :  { %s1535_s20 = smov [#allocation11]  }
  0x1d   :  { %s55_s21 = sshll.u32 %s1535_s20, 4  ;;  %s56_s21 = int_to_ptr.vmem [resolvable:$true] %s55_s21 }
  0x1e   :  { %s1513_s2 = scalar_lea.vmem %s56_s21, 4096  ;;  %p1518_p11 = scmp.lt.s32.totalorder %s56_s21, %s56_s21 }
  0x1f   :  { %p1514_p10 = scmp.ne.s32.totalorder %s56_s21, %s1513_s2  ;;  %p1519_p12 = scmp.lt.s32.totalorder %s1513_s2, %s1513_s2 }
  0x21   :  { %p1520_p13 = por %p1519_p12, %p1518_p11 }
  0x23   :  { %p1521_p0 = pnand %p1520_p13, %p1514_p10 }
  0x25   :  { %1524 = shalt.err (!%p1521_p0)
}
  0x26   :  { %s1536_s22 = smov 64   ;;  %s1537_s23 = smov 4  }
  0x27   :  { %61 = dma.hbm_to_vmem [thread:$0]  %s1635_s4, 4096, %s56_s21, [#allocation10], %s1536_s22, %s1536_s22, %s1537_s23  }
  0x28   :  { %1525 = dma.done.wait [#allocation8], 2048  }
  0x29   :  { %1526 = vsyncadd [#allocation8], 4294965248 }
  0x2a   :  { %1527 = dma.done.wait [#allocation10], 12288  }
  0x2b   :  { %1528 = vsyncadd [#allocation10], 4294955008  ;;  %v1538_v2 = vmov 0   ;;  %v1312_v3 = vld [vmem:[#allocation7 + $0x74] ss:$8 sps:$4 sm:$0xff]   ;;  %v85_v6 = vlaneseq }
  0x2c   :  { %248 = vmatprep.mubr.bf16.mxu0 %v1538_v2  ;;  %v1314_v4 = vld [vmem:[#allocation7 + $0x70] ss:$8 sps:$4 sm:$0xff]   ;;  %216 = vmatprep.subr.bf16.mxu0 %v1312_v3  ;;  %v1315_v5 = vld [vmem:[#allocation7 + $0x64] ss:$8 sps:$4 sm:$0xff]   ;;  %v1317_v7 = vld [vmem:[#allocation7 + $0x60] ss:$8 sps:$4 sm:$0xff]  }
  0x2d   :  { %217 = vmatpush1.bf16.msra.mxu0 %v1314_v4  ;;  %v1318_v8 = vld [vmem:[#allocation7 + $0x54] ss:$8 sps:$4 sm:$0xff]   ;;  %v86_v9 = vand.u32 127, %v85_v6  ;;  %v1320_v10 = vld [vmem:[#allocation7 + $0x50] ss:$8 sps:$4 sm:$0xff]  }
  0x2e   :  { %218 = vmatprep.subr.bf16.mxu0 %v1315_v5  ;;  %v1321_v11 = vld [vmem:[#allocation7 + $0x44] ss:$8 sps:$4 sm:$0xff]   ;;  %v1323_v12 = vld [vmem:[#allocation7 + $0x40] ss:$8 sps:$4 sm:$0xff]   ;;  %v1324_v16 = vld [vmem:[#allocation7 + $0x34] ss:$8 sps:$4 sm:$0xff]  }
  0x2f   :  { %v82_v13 = vld [vmem:[%s1637_s6] sm:$0xf]  ;;  %vm88_vm0 = vcmp.lt.s32.totalorder %v86_v9, 120  ;;  %v1337_v15 = vld [vmem:[#allocation9 + $0xe4] ss:$16 sps:$4 sm:$0xff]  }
  0x30   :  { %v83_v14 = vunpack.c.l.bf16 %v82_v13  ;;  %671 = vmatprep.subr.bf16.mxu1 %v1337_v15  ;;  %v1342_v18 = vld [vmem:[#allocation9 + $0xe0] ss:$16 sps:$4 sm:$0xff]   ;;  %v1343_v20 = vld [vmem:[#allocation9 + $0xc4] ss:$16 sps:$4 sm:$0xff]   ;;  %v1341_v34 = vld [vmem:[#allocation9 + $0xec] ss:$16 sps:$4 sm:$0xff]  }
  0x31   :  { %219 = vmatpush1.bf16.msra.mxu0 %v1317_v7  ;;  %v1326_v21 = vld [vmem:[#allocation7 + $0x30] ss:$8 sps:$4 sm:$0xff]   ;;  %v1327_v22 = vld [vmem:[#allocation7 + $0x24] ss:$8 sps:$4 sm:$0xff]   ;;  %672 = vmatpush1.bf16.msra.mxu1 %v1342_v18  ;;  %v1329_v25 = vld [vmem:[#allocation7 + $0x20] ss:$8 sps:$4 sm:$0xff]  }
  0x32   :  { %220 = vmatprep.subr.bf16.mxu0 %v1318_v8  ;;  %v89_v17 = vsel %vm88_vm0, %v83_v14, %v1587_v1  ;;  %673 = vmatprep.subr.bf16.mxu1 %v1343_v20  ;;  %v1348_v23 = vld [vmem:[#allocation9 + $0xc0] ss:$16 sps:$4 sm:$0xff]   ;;  %v1349_v24 = vld [vmem:[#allocation9 + $0xa4] ss:$16 sps:$4 sm:$0xff]   ;;  %v1339_v38 = vld [vmem:[#allocation9 + $0xe8] ss:$16 sps:$4 sm:$0xff]  }
  0x33   :  { %v1251_v19 = vpack.c.bf16 %v1587_v1, %v89_v17  ;;  %v1330_v26 = vld [vmem:[#allocation7 + $0x14] ss:$8 sps:$4 sm:$0xff]   ;;  %v1354_v27 = vld [vmem:[#allocation9 + $0xa0] ss:$16 sps:$4 sm:$0xff]   ;;  %v1333_v31 = vld [vmem:[#allocation7 + $0x4] ss:$8 sps:$4 sm:$0xff]  }
  0x34   :  { %v1355_v28 = vld [vmem:[#allocation9 + $0x84] ss:$16 sps:$4 sm:$0xff]   ;;  %v1332_v29 = vld [vmem:[#allocation7 + $0x10] ss:$8 sps:$4 sm:$0xff]   ;;  %v1335_v33 = vld [vmem:[#allocation7] ss:$8 sps:$4 sm:$0xff]  }
  0x35   :  { %221 = vmatpush1.bf16.msra.mxu0 %v1320_v10  ;;  %1252 = vst [vmem:[#allocation12] sm:$0xff] %v1251_v19   ;;  %674 = vmatpush1.bf16.msra.mxu1 %v1348_v23  ;;  %v1360_v30 = vld [vmem:[#allocation9 + $0x80] ss:$16 sps:$4 sm:$0xff]   ;;  %v1361_v32 = vld [vmem:[#allocation9 + $0x64] ss:$16 sps:$4 sm:$0xff]  }
  0x36   :  { %222 = vmatprep.subr.bf16.mxu0 %v1321_v11  ;;  %675 = vmatprep.subr.bf16.mxu1 %v1349_v24  ;;  %v1366_v35 = vld [vmem:[#allocation9 + $0x60] ss:$16 sps:$4 sm:$0xff]   ;;  %v1367_v36 = vld [vmem:[#allocation9 + $0x44] ss:$16 sps:$4 sm:$0xff]   ;;  %v1347_v40 = vld [vmem:[#allocation9 + $0xcc] ss:$16 sps:$4 sm:$0xff]  }
  0x37   :  { %v1372_v39 = vld [vmem:[#allocation9 + $0x40] ss:$16 sps:$4 sm:$0xff]   ;;  %v1373_v41 = vld [vmem:[#allocation9 + $0x24] ss:$16 sps:$4 sm:$0xff]   ;;  %v1345_v42 = vld [vmem:[#allocation9 + $0xc8] ss:$16 sps:$4 sm:$0xff]  }
  0x38   :  { %v1353_v43 = vld [vmem:[#allocation9 + $0xac] ss:$16 sps:$4 sm:$0xff]   ;;  %v1378_v44 = vld [vmem:[#allocation9 + $0x20] ss:$16 sps:$4 sm:$0xff]   ;;  %v1379_v45 = vld [vmem:[#allocation9 + $0x4] ss:$16 sps:$4 sm:$0xff]  }
  0x39   :  { %223 = vmatpush1.bf16.msra.mxu0 %v1323_v12  ;;  %676 = vmatpush1.bf16.msra.mxu1 %v1354_v27  ;;  %v1351_v46 = vld [vmem:[#allocation9 + $0xa8] ss:$16 sps:$4 sm:$0xff]   ;;  %v1384_v47 = vld [vmem:[#allocation9] ss:$16 sps:$4 sm:$0xff]   ;;  %v1359_v48 = vld [vmem:[#allocation9 + $0x8c] ss:$16 sps:$4 sm:$0xff]  }
  0x3a   :  { %224 = vmatprep.subr.bf16.mxu0 %v1324_v16  ;;  %677 = vmatprep.subr.bf16.mxu1 %v1355_v28  ;;  %v1385_v49 = vld [vmem:[#allocation9 + $0x1e4] ss:$16 sps:$4 sm:$0xff]   ;;  %v1357_v50 = vld [vmem:[#allocation9 + $0x88] ss:$16 sps:$4 sm:$0xff]   ;;  %v1365_v51 = vld [vmem:[#allocation9 + $0x6c] ss:$16 sps:$4 sm:$0xff]  }
  0x3b   :  { %v1390_v52 = vld [vmem:[#allocation9 + $0x1e0] ss:$16 sps:$4 sm:$0xff]   ;;  %v1391_v53 = vld [vmem:[#allocation9 + $0x1c4] ss:$16 sps:$4 sm:$0xff]   ;;  %v1363_v54 = vld [vmem:[#allocation9 + $0x68] ss:$16 sps:$4 sm:$0xff]  }
  0x3c   :  { %v1336_v37 = vld [vmem:[#allocation12] sm:$0xff]   ;;  %v1371_v55 = vld [vmem:[#allocation9 + $0x4c] ss:$16 sps:$4 sm:$0xff]   ;;  %v1369_v58 = vld [vmem:[#allocation9 + $0x48] ss:$16 sps:$4 sm:$0xff]  }
  0x3d   :  { %225 = vmatpush1.bf16.msra.mxu0 %v1326_v21  ;;  %678 = vmatpush1.bf16.msra.mxu1 %v1360_v30  ;;  %v1396_v56 = vld [vmem:[#allocation9 + $0x1c0] ss:$16 sps:$4 sm:$0xff]   ;;  %v1397_v57 = vld [vmem:[#allocation9 + $0x1a4] ss:$16 sps:$4 sm:$0xff]   ;;  %v1377_v60 = vld [vmem:[#allocation9 + $0x2c] ss:$16 sps:$4 sm:$0xff]  }
  0x3e   :  { %226 = vmatprep.subr.bf16.mxu0 %v1327_v22  ;;  %679 = vmatprep.subr.bf16.mxu1 %v1361_v32  ;;  %v1402_v59 = vld [vmem:[#allocation9 + $0x1a0] ss:$16 sps:$4 sm:$0xff]   ;;  %v1403_v61 = vld [vmem:[#allocation9 + $0x184] ss:$16 sps:$4 sm:$0xff]   ;;  %v1375_v62 = vld [vmem:[#allocation9 + $0x28] ss:$16 sps:$4 sm:$0xff]  }
  0x3f   :  { %v1408_v63 = vld [vmem:[#allocation9 + $0x180] ss:$16 sps:$4 sm:$0xff]   ;;  %v1383_v0 = vld [vmem:[#allocation9 + $0xc] ss:$16 sps:$4 sm:$0xff]   ;;  %v1409_v1 = vld [vmem:[#allocation9 + $0x164] ss:$16 sps:$4 sm:$0xff]  }
  0x40   :  { %v1381_v2 = vld [vmem:[#allocation9 + $0x8] ss:$16 sps:$4 sm:$0xff]   ;;  %v1414_v3 = vld [vmem:[#allocation9 + $0x160] ss:$16 sps:$4 sm:$0xff]   ;;  %v1389_v4 = vld [vmem:[#allocation9 + $0x1ec] ss:$16 sps:$4 sm:$0xff]  }
  0x41   :  { %227 = vmatpush1.bf16.msra.mxu0 %v1329_v25  ;;  %680 = vmatpush1.bf16.msra.mxu1 %v1366_v35  ;;  %v1387_v5 = vld [vmem:[#allocation9 + $0x1e8] ss:$16 sps:$4 sm:$0xff]   ;;  %v1395_v7 = vld [vmem:[#allocation9 + $0x1cc] ss:$16 sps:$4 sm:$0xff]   ;;  %v1415_v15 = vld [vmem:[#allocation9 + $0x144] ss:$16 sps:$4 sm:$0xff]  }
  0x42   :  { %228 = vmatprep.subr.bf16.mxu0 %v1330_v26  ;;  %681 = vmatprep.subr.bf16.mxu1 %v1367_v36  ;;  %v1393_v8 = vld [vmem:[#allocation9 + $0x1c8] ss:$16 sps:$4 sm:$0xff]   ;;  %v1401_v9 = vld [vmem:[#allocation9 + $0x1ac] ss:$16 sps:$4 sm:$0xff]   ;;  %v1420_v18 = vld [vmem:[#allocation9 + $0x140] ss:$16 sps:$4 sm:$0xff]  }
  0x43   :  { %v1399_v10 = vld [vmem:[#allocation9 + $0x1a8] ss:$16 sps:$4 sm:$0xff]   ;;  %v1407_v11 = vld [vmem:[#allocation9 + $0x18c] ss:$16 sps:$4 sm:$0xff]   ;;  %v1421_v19 = vld [vmem:[#allocation9 + $0x124] ss:$16 sps:$4 sm:$0xff]  }
  0x44   :  { %v1405_v12 = vld [vmem:[#allocation9 + $0x188] ss:$16 sps:$4 sm:$0xff]   ;;  %v1413_v13 = vld [vmem:[#allocation9 + $0x16c] ss:$16 sps:$4 sm:$0xff]   ;;  %v1426_v22 = vld [vmem:[#allocation9 + $0x120] ss:$16 sps:$4 sm:$0xff]  }
  0x45   :  { %229 = vmatpush1.bf16.msra.mxu0 %v1332_v29  ;;  %682 = vmatpush1.bf16.msra.mxu1 %v1372_v39  ;;  %v1411_v14 = vld [vmem:[#allocation9 + $0x168] ss:$16 sps:$4 sm:$0xff]   ;;  %v1419_v16 = vld [vmem:[#allocation9 + $0x14c] ss:$16 sps:$4 sm:$0xff]   ;;  %v1427_v23 = vld [vmem:[#allocation9 + $0x104] ss:$16 sps:$4 sm:$0xff]  }
  0x46   :  { %230 = vmatprep.subr.bf16.mxu0 %v1333_v31  ;;  %683 = vmatprep.subr.bf16.mxu1 %v1373_v41  ;;  %v1417_v17 = vld [vmem:[#allocation9 + $0x148] ss:$16 sps:$4 sm:$0xff]   ;;  %v1425_v20 = vld [vmem:[#allocation9 + $0x12c] ss:$16 sps:$4 sm:$0xff]   ;;  %v1432_v26 = vld [vmem:[#allocation9 + $0x100] ss:$16 sps:$4 sm:$0xff]  }
  0x47   :  { %v1423_v21 = vld [vmem:[#allocation9 + $0x128] ss:$16 sps:$4 sm:$0xff]   ;;  %v1431_v24 = vld [vmem:[#allocation9 + $0x10c] ss:$16 sps:$4 sm:$0xff]   ;;  %v1605_v29 = vshrl.u32 %v85_v6, 7 }
  0x48   :  { %v1429_v25 = vld [vmem:[#allocation9 + $0x108] ss:$16 sps:$4 sm:$0xff]   ;;  %v118_v32 = vld [vmem:[%s1632_s1] sm:$0x3] }
  0x49   :  { %231 = vmatpush1.bf16.msra.mxu0 %v1335_v33  ;;  %684 = vmatpush1.bf16.msra.mxu1 %v1378_v44  ;;  %v1433_v27 = vld [vmem:[#allocation11 + $0x78] sm:$0xff]   ;;  %v126_v30 = vsub.s32 1, %v1605_v29  ;;  %v122_v31 = vsub.s32 0, %v1605_v29 }
  0x4a   :  { %714 = vmatprep.subr.bf16.mxu0 %v1341_v34  ;;  %685 = vmatprep.subr.bf16.mxu1 %v1379_v45  ;;  %v1434_v28 = vld [vmem:[#allocation11 + $0xf8] sm:$0xff]  }
  0x4b   :  { %v127_v34 = vrot.slane %v118_v32, %v126_v30  ;;  %v123_v35 = vrot.slane %v118_v32, %v122_v31 }
  0x4c   :  { %249 = vmatmul.mubr.bf16.vlgmr.msra.gmra.mxu0 %v1336_v37 }
  0x4d   :  { %715 = vmatpush1.bf16.msra.mxu0 %v1339_v38  ;;  %686 = vmatpush1.bf16.msra.mxu1 %v1384_v47  ;;  %v1435_v47 = vld [vmem:[#allocation11 + $0x38] sm:$0xff]  }
  0x4e   :  { %716 = vmatprep.subr.bf16.mxu0 %v1347_v40  ;;  %687 = vmatprep.subr.bf16.mxu1 %v1385_v49 }
  0x51   :  { %717 = vmatpush1.bf16.msra.mxu0 %v1345_v42  ;;  %688 = vmatpush2.bf16.msra.mxu1 %v1390_v52  ;;  %v1439_v52 = vld [vmem:[#allocation11 + $0x30] sm:$0xff]  }
  0x52   :  { %718 = vmatprep.subr.bf16.mxu0 %v1353_v43  ;;  %689 = vmatprep.subr.bf16.mxu1 %v1391_v53  ;;  %v1440_v53 = vld [vmem:[#allocation11 + $0xb0] sm:$0xff]  }
  0x55   :  { %719 = vmatpush1.bf16.msra.mxu0 %v1351_v46  ;;  %690 = vmatpush2.bf16.msra.mxu1 %v1396_v56  ;;  %v1443_v56 = vld [vmem:[#allocation11 + $0x28] sm:$0xff]  }
  0x56   :  { %720 = vmatprep.subr.bf16.mxu0 %v1359_v48  ;;  %691 = vmatprep.subr.bf16.mxu1 %v1397_v57  ;;  %v1436_v48 = vld [vmem:[#allocation11 + $0xb8] sm:$0xff]   ;;  %v1444_v57 = vld [vmem:[#allocation11 + $0xa8] sm:$0xff]  }
  0x59   :  { %721 = vmatpush1.bf16.msra.mxu0 %v1357_v50  ;;  %692 = vmatpush2.bf16.msra.mxu1 %v1402_v59  ;;  %v1437_v50 = vld [vmem:[#allocation11 + $0x70] sm:$0xff]   ;;  %v1446_v59 = vld [vmem:[#allocation11 + $0xe0] sm:$0xff]  }
  0x5a   :  { %722 = vmatprep.subr.bf16.mxu0 %v1365_v51  ;;  %693 = vmatprep.subr.bf16.mxu1 %v1403_v61  ;;  %v1438_v51 = vld [vmem:[#allocation11 + $0xf0] sm:$0xff]   ;;  %v1448_v61 = vld [vmem:[#allocation11 + $0xa0] sm:$0xff]  }
  0x5d   :  { %723 = vmatpush1.bf16.msra.mxu0 %v1363_v54  ;;  %694 = vmatpush2.bf16.msra.mxu1 %v1408_v63  ;;  %v1441_v54 = vld [vmem:[#allocation11 + $0x68] sm:$0xff]   ;;  %v1450_v63 = vld [vmem:[#allocation11 + $0xd8] sm:$0xff]  }
  0x5e   :  { %724 = vmatprep.subr.bf16.mxu0 %v1371_v55  ;;  %695 = vmatprep.subr.bf16.mxu1 %v1409_v1  ;;  %v1442_v55 = vld [vmem:[#allocation11 + $0xe8] sm:$0xff]   ;;  %v1452_v1 = vld [vmem:[#allocation11 + $0x98] sm:$0xff]  }
  0x61   :  { %725 = vmatpush1.bf16.msra.mxu0 %v1369_v58  ;;  %696 = vmatpush2.bf16.msra.mxu1 %v1414_v3  ;;  %v1445_v58 = vld [vmem:[#allocation11 + $0x60] sm:$0xff]   ;;  %v1454_v3 = vld [vmem:[#allocation11 + $0xd0] sm:$0xff]  }
  0x62   :  { %726 = vmatprep.subr.bf16.mxu0 %v1377_v60  ;;  %697 = vmatprep.subr.bf16.mxu1 %v1415_v15  ;;  %v1447_v60 = vld [vmem:[#allocation11 + $0x20] sm:$0xff]   ;;  %v345_v15 = vsub.s32 3, %v1605_v29 }
  0x65   :  { %727 = vmatpush1.bf16.msra.mxu0 %v1375_v62  ;;  %698 = vmatpush2.bf16.msra.mxu1 %v1420_v18  ;;  %v1449_v62 = vld [vmem:[#allocation11 + $0x58] sm:$0xff]  }
  0x66   :  { %728 = vmatprep.subr.bf16.mxu0 %v1383_v0  ;;  %699 = vmatprep.subr.bf16.mxu1 %v1421_v19  ;;  %v1451_v0 = vld [vmem:[#allocation11 + $0x18] sm:$0xff]  }
  0x69   :  { %729 = vmatpush1.bf16.msra.mxu0 %v1381_v2  ;;  %700 = vmatpush2.bf16.msra.mxu1 %v1426_v22  ;;  %v1453_v2 = vld [vmem:[#allocation11 + $0x50] sm:$0xff]  }
  0x6a   :  { %730 = vmatprep.subr.bf16.mxu0 %v1389_v4  ;;  %701 = vmatprep.subr.bf16.mxu1 %v1427_v23  ;;  %v1455_v4 = vld [vmem:[#allocation11 + $0x10] sm:$0xff]  }
  0x6d   :  { %731 = vmatpush2.bf16.msra.mxu0 %v1387_v5  ;;  %702 = vmatpush2.bf16.msra.mxu1 %v1432_v26  ;;  %v1456_v5 = vld [vmem:[#allocation11 + $0x90] sm:$0xff]  }
  0x6e   :  { %732 = vmatprep.subr.bf16.mxu0 %v1395_v7  ;;  %1258 = vmatprep.subr.bf16.mxu1 %v1433_v27  ;;  %v1457_v7 = vld [vmem:[#allocation11 + $0x48] sm:$0xff]  }
  0x71   :  { %733 = vmatpush2.bf16.msra.mxu0 %v1393_v8  ;;  %v1458_v8 = vld [vmem:[#allocation11 + $0xc8] sm:$0xff]  }
  0x72   :  { %734 = vmatprep.subr.bf16.mxu0 %v1401_v9  ;;  %v1459_v9 = vld [vmem:[#allocation11 + $0x8] sm:$0xff]  }
  0x75   :  { %735 = vmatpush2.bf16.msra.mxu0 %v1399_v10  ;;  %v1460_v10 = vld [vmem:[#allocation11 + $0x88] sm:$0xff]  }
  0x76   :  { %736 = vmatprep.subr.bf16.mxu0 %v1407_v11  ;;  %v1461_v11 = vld [vmem:[#allocation11 + $0x40] sm:$0xff]  }
  0x79   :  { %737 = vmatpush2.bf16.msra.mxu0 %v1405_v12  ;;  %v1462_v12 = vld [vmem:[#allocation11 + $0xc0] sm:$0xff]  }
  0x7a   :  { %738 = vmatprep.subr.bf16.mxu0 %v1413_v13  ;;  %v1463_v13 = vld [vmem:[#allocation11] sm:$0xff]  }
  0x7d   :  { %739 = vmatpush2.bf16.msra.mxu0 %v1411_v14  ;;  %v1464_v14 = vld [vmem:[#allocation11 + $0x80] sm:$0xff]  }
  0x7e   :  { %740 = vmatprep.subr.bf16.mxu0 %v1419_v16  ;;  %v341_v16 = vsub.s32 2, %v1605_v29 }
  0x81   :  { %741 = vmatpush2.bf16.msra.mxu0 %v1417_v17  ;;  %v329_v17 = vld [vmem:[%s1634_s3] sm:$0xf] }
  0x82   :  { %742 = vmatprep.subr.bf16.mxu0 %v1425_v20  ;;  %v338_v20 = vrot.slane %v329_v17, %v126_v30  ;;  %v334_v22 = vrot.slane %v329_v17, %v122_v31  ;;  %v342_v23 = vrot.slane %v329_v17, %v341_v16 }
  0x85   :  { %743 = vmatpush2.bf16.msra.mxu0 %v1423_v21  ;;  %v346_v21 = vrot.slane %v329_v17, %v345_v15 }
  0x86   :  { %744 = vmatprep.subr.bf16.mxu0 %v1431_v24 }
  0x89   :  { %745 = vmatpush2.bf16.msra.mxu0 %v1429_v25 }
  0x8a   :  { %1280 = vmatprep.subr.bf16.mxu0 %v1434_v28 }
 0x10c   :  { %v250_v33 = vpop.f32.mrf.mxu0 }
 0x10d   :  { %v251_v39 = vadd.f32 %v250_v33, %v123_v35 }
 0x10e   :  { %v252_v36 = vpop.f32.mrf.mxu0 }
 0x10f   :  { %v253_v38 = vadd.f32 %v252_v36, %v127_v34  ;;  %v259_v45 = vmax.f32 %v251_v39, 0.0 }
 0x110   :  { %v254_v37 = vpop.f32.mrf.mxu0 }
 0x111   :  { %v255_v6 = vadd.f32 %v254_v37, %v123_v35  ;;  %v260_v43 = vmax.f32 %v253_v38, 0.0 }
 0x112   :  { %v256_v40 = vpop.f32.mrf.mxu0 }
 0x113   :  { %v257_v41 = vadd.f32 %v256_v40, %v127_v34  ;;  %v261_v42 = vmax.f32 %v255_v6, 0.0 }
 0x115   :  { %v262_v44 = vmax.f32 %v257_v41, 0.0  ;;  %v263_v49 = vpack.c.bf16 %v261_v42, %v259_v45 }
 0x117   :  { %v264_v46 = vpack.c.bf16 %v262_v44, %v260_v43 }
 0x119   :  { %703 = vmatprep.mubr.bf16.mxu1 %v264_v46  ;;  %746 = vmatprep.mubr.bf16.mxu0 %v264_v46 }
 0x11a   :  { %704 = vmatmul.mubr.bf16.vlgmr.msra.gmra.mxu1 %v263_v49  ;;  %747 = vmatmul.mubr.bf16.vlgmr.msra.gmra.mxu0 %v263_v49 }
 0x11b   :  { %1259 = vmatpush3.bf16.msra.mxu1 %v1435_v47  ;;  %1281 = vmatpush3.bf16.msra.mxu0 %v1436_v48 }
 0x11c   :  { %1260 = vmatprep.subr.bf16.mxu1 %v1437_v50  ;;  %1282 = vmatprep.subr.bf16.mxu0 %v1438_v51 }
 0x11f   :  { %1261 = vmatpush3.bf16.msra.mxu1 %v1439_v52  ;;  %1283 = vmatpush3.bf16.msra.mxu0 %v1440_v53 }
 0x120   :  { %1262 = vmatprep.subr.bf16.mxu1 %v1441_v54  ;;  %1284 = vmatprep.subr.bf16.mxu0 %v1442_v55  ;;  %v1211_v54 = vld [vmem:[%s1636_s5] ss:$0 sm:$0xff] }
 0x123   :  { %1263 = vmatpush3.bf16.msra.mxu1 %v1443_v56  ;;  %1285 = vmatpush3.bf16.msra.mxu0 %v1444_v57 }
 0x124   :  { %1264 = vmatprep.subr.bf16.mxu1 %v1445_v58  ;;  %1286 = vmatprep.subr.bf16.mxu0 %v1446_v59 }
 0x127   :  { %1265 = vmatpush3.bf16.msra.mxu1 %v1447_v60  ;;  %1287 = vmatpush3.bf16.msra.mxu0 %v1448_v61 }
 0x128   :  { %1266 = vmatprep.subr.bf16.mxu1 %v1449_v62  ;;  %1288 = vmatprep.subr.bf16.mxu0 %v1450_v63 }
 0x12b   :  { %1267 = vmatpush3.bf16.msra.mxu1 %v1451_v0  ;;  %1289 = vmatpush3.bf16.msra.mxu0 %v1452_v1 }
 0x12c   :  { %1268 = vmatprep.subr.bf16.mxu1 %v1453_v2  ;;  %1290 = vmatprep.subr.bf16.mxu0 %v1454_v3 }
 0x12f   :  { %1269 = vmatpush3.bf16.msra.mxu1 %v1455_v4  ;;  %1291 = vmatpush3.bf16.msra.mxu0 %v1456_v5 }
 0x130   :  { %1270 = vmatprep.subr.bf16.mxu1 %v1457_v7  ;;  %1292 = vmatprep.subr.bf16.mxu0 %v1458_v8 }
 0x133   :  { %1271 = vmatpush3.bf16.msra.mxu1 %v1459_v9  ;;  %1293 = vmatpush3.bf16.msra.mxu0 %v1460_v10 }
 0x134   :  { %1272 = vmatprep.subr.bf16.mxu1 %v1461_v11  ;;  %1294 = vmatprep.subr.bf16.mxu0 %v1462_v12 }
 0x137   :  { %1273 = vmatpush3.bf16.msra.mxu1 %v1463_v13  ;;  %1295 = vmatpush3.bf16.msra.mxu0 %v1464_v14 }
 0x1da   :  { %v705_v18 = vpop.f32.mrf.mxu1  ;;  %v748_v19 = vpop.f32.mrf.mxu0 }
 0x1db   :  { %v706_v35 = vadd.f32 %v705_v18, %v334_v22  ;;  %v749_v36 = vadd.f32 %v748_v19, %v342_v23 }
 0x1dc   :  { %v707_v24 = vpop.f32.mrf.mxu1  ;;  %v750_v25 = vpop.f32.mrf.mxu0 }
 0x1dd   :  { %v708_v28 = vadd.f32 %v707_v24, %v338_v20  ;;  %v751_v32 = vadd.f32 %v750_v25, %v346_v21  ;;  %v757_v43 = vmax.f32 %v706_v35, 0.0  ;;  %v759_v44 = vmax.f32 %v749_v36, 0.0 }
 0x1de   :  { %v709_v26 = vpop.f32.mrf.mxu1  ;;  %v752_v27 = vpop.f32.mrf.mxu0 }
 0x1df   :  { %v710_v33 = vadd.f32 %v709_v26, %v334_v22  ;;  %v753_v34 = vadd.f32 %v752_v27, %v342_v23  ;;  %v758_v41 = vmax.f32 %v708_v28, 0.0  ;;  %v760_v29 = vmax.f32 %v751_v32, 0.0 }
 0x1e0   :  { %v711_v37 = vpop.f32.mrf.mxu1  ;;  %v754_v38 = vpop.f32.mrf.mxu0 }
 0x1e1   :  { %v712_v6 = vadd.f32 %v711_v37, %v338_v20  ;;  %v755_v39 = vadd.f32 %v754_v38, %v346_v21  ;;  %v761_v30 = vmax.f32 %v710_v33, 0.0  ;;  %v763_v40 = vmax.f32 %v753_v34, 0.0 }
 0x1e3   :  { %v762_v31 = vmax.f32 %v712_v6, 0.0  ;;  %v764_v42 = vmax.f32 %v755_v39, 0.0  ;;  %v765_v47 = vpack.c.bf16 %v761_v30, %v757_v43  ;;  %v767_v48 = vpack.c.bf16 %v763_v40, %v759_v44 }
 0x1e5   :  { %v766_v45 = vpack.c.bf16 %v762_v31, %v758_v41  ;;  %v768_v46 = vpack.c.bf16 %v764_v42, %v760_v29 }
 0x1e7   :  { %1064 = vmatprep.mubr.bf16.mxu1 %v766_v45  ;;  %1105 = vmatprep.mubr.bf16.mxu0 %v768_v46 }
 0x1e8   :  { %1065 = vmatmul.mubr.bf16.vlgmr.msra.gmra.mxu1 %v765_v47  ;;  %1106 = vmatmul.mubr.bf16.vlgmr.msra.gmra.mxu0 %v767_v48 }
 0x2a8   :  { %v1274_v49 = vpop.f32.mrf.mxu1  ;;  %v1296_v50 = vpop.f32.mrf.mxu0 }
 0x2aa   :  { %v1275_v51 = vpop.f32.mrf.mxu1  ;;  %v1297_v52 = vpop.f32.mrf.mxu0 }
 0x2ab   :  { %v1276_v53 = vadd.f32 %v1275_v51, %v1274_v49  ;;  %v1298_v61 = vadd.f32 %v1297_v52, %v1296_v50 }
 0x2ac   :  { %v1277_v55 = vpop.f32.mrf.mxu1  ;;  %v1299_v56 = vpop.f32.mrf.mxu0 }
 0x2ad   :  { %v1067_v59 = vadd.f32 %v1276_v53, %v1211_v54 }
 0x2ae   :  { %v1278_v57 = vpop.f32.mrf.mxu1  ;;  %v1300_v58 = vpop.f32.mrf.mxu0 }
 0x2af   :  { %v1279_v60 = vadd.f32 %v1278_v57, %v1277_v55  ;;  %v1301_v63 = vadd.f32 %v1300_v58, %v1299_v56  ;;  %v1108_v0 = vadd.f32 %v1298_v61, %v1067_v59 }
 0x2b1   :  { %v1070_v62 = vadd.f32 %v1279_v60, %v1211_v54 }
 0x2b3   :  { %v1111_v1 = vadd.f32 %v1301_v63, %v1070_v62 }
 0x2b5   :  { %v1256_v2 = vpack.c.bf16 %v1111_v1, %v1108_v0 }
 0x2b7   :  { %1257 = vst [vmem:[%s1639_s8] sm:$0xff] %v1256_v2  }
 0x2b8   :  { %1128 = vsyncpa [#allocation8], 1 }
 0x2b9   :  { %1129 = vsyncpa [#allocation10], 1 }

</bundles_post_ra>
